<compile_context>
chip_gen: v7x
topology: tpu7x:2x2x1
jax: 0.10.0
libtpu: 0.0.40
codegen_flags: <defaults>
</compile_context>

<pallas_src>
import math

import jax
import jax.numpy as jnp
from jax.experimental import pallas as pl
from jax.experimental.pallas import tpu as pltpu


def _round_up(x, m):
    return ((x + m - 1) // m) * m


def _nade_layer_kernel(x_ref, w_ref, tri_ref, b_ref, o_ref):
    x = x_ref[...]      # (TB, Np)    matmul dtype, zero beyond the real N cols
    w = w_ref[...]      # (Nhp, Np)   NadeLayer.weights, zero-padded, pre-cast
    tri = tri_ref[...]  # (Np, Np)    tri[j, l] = 1 where j < l (prefix matrix)
    b = b_ref[...]      # (Nhp, 1)    NadeLayer.bias, f32, zero-padded

    TB, Np = x.shape
    Nhp = w.shape[0]

    # M[b, i, j] = W[i, j] * x[b, j] -- both operands already in matmul dtype.
    m = x[:, None, :] * w[None, :, :]                       # (TB, Nhp, Np)

    # out[b, i, l] = sum_j M[b, i, j] * [j < l] as one lane-dense MXU matmul.
    # Leading-dim collapse (TB, Nhp) -> TB*Nhp is layout-free (Nhp % 16 == 0).
    out = jnp.dot(m.reshape(TB * Nhp, Np), tri,
                  preferred_element_type=jnp.float32).reshape(TB, Nhp, Np)

    # bias[i] broadcast over the batch rows and over the l lanes.
    o_ref[...] = (out + b[None, :, :]).astype(o_ref.dtype)


def prepare_nade_params(w, b, *, use_bf16_matmul=True):
    """One-time, per-parameter-set layout plumbing (hoisted out of the
    per-call path): zero-pad to lane/sublane-dense shapes, pre-cast the matmul
    operands, and build the (Np, Np) strict prefix matrix."""
    Nh, N = w.shape
    Np = _round_up(N, 128)     # lane-dense feature axis
    Nhp = _round_up(Nh, 16)    # sublane-dense hidden axis (16 covers bf16 packing)
    mm = jnp.bfloat16 if use_bf16_matmul else jnp.float32

    w_p = jnp.zeros((Nhp, Np), mm).at[:Nh, :N].set(w.astype(mm))
    b_p = jnp.zeros((Nhp, 1), jnp.float32).at[:Nh, 0].set(b.astype(jnp.float32))

    # T[j, l] = 1 where j < l; 0/1 is exact in bf16.  Padded j rows never leak
    # into the result because x / W are zero there.
    j_idx = jax.lax.broadcasted_iota(jnp.int32, (Np, Np), 0)
    l_idx = jax.lax.broadcasted_iota(jnp.int32, (Np, Np), 1)
    tri = (j_idx < l_idx).astype(mm)

    meta = dict(N=N, Nh=Nh, Np=Np, Nhp=Nhp, mm_dtype=mm)
    return w_p, b_p, tri, meta


def _vmem_budget_bytes():
    # Generation-aware: ~75% of physical VMEM (v7x: 64 MiB/TC, v5e/v6e:
    # 128 MiB), capped at 100 MiB; falls back to a v7x-safe 48 MiB.
    try:
        cap = pltpu.get_tpu_info().vmem_capacity_bytes
    except Exception:
        cap = 64 * 1024 * 1024
    return int(min(cap * 3 // 4, 100 * 1024 * 1024))


def _pick_batch_tile(B, Np, Nhp, mm_bytes, budget):
    """Largest batch tile whose per-step footprint fits the VMEM budget."""
    out_bytes = 4
    # Grid-invariant operands are double-buffered by default (pl.Buffered(1)
    # would halve this; left default for lowering safety and budgeted here).
    resident = 2 * (Nhp * Np * mm_bytes + Np * Np * mm_bytes + Nhp * 4)
    per_tb = (2 * Np * mm_bytes               # x tile (double-buffered)
              + 2 * Nhp * Np * out_bytes      # out tile (double-buffered)
              + Nhp * Np * mm_bytes           # M intermediate
              + Nhp * Np * 4)                 # f32 matmul result
    avail = max(budget - resident, 8 * per_tb)
    tb = max(8, min(256, avail // per_tb) // 8 * 8)
    # Keep >= 2 grid steps when the batch allows (pipelining + v7x megacore)
    # and never over-pad a small batch.
    if B > 8:
        tb = min(tb, _round_up((B + 1) // 2, 8))
    else:
        tb = 8
    return int(tb)


def nade_layer_forward(x, w_p, b_p, tri, meta, *, batch_tile=None):
    """Pallas NadeLayer forward: x (B, N) -> out (B, N_h, N) float32."""
    B, N = x.shape
    assert N == meta["N"]
    Np, Nhp, Nh = meta["Np"], meta["Nhp"], meta["Nh"]
    mm = meta["mm_dtype"]
    mm_bytes = jnp.dtype(mm).itemsize

    budget = _vmem_budget_bytes()
    TB = batch_tile or _pick_batch_tile(B, Np, Nhp, mm_bytes, budget)
    assert TB % 8 == 0
    Bp = _round_up(B, TB)

    # Per-call plumbing: pad batch / lanes and pre-cast x (padded lanes are
    # zero, so they contribute nothing to the contraction).
    x_p = jnp.zeros((Bp, Np), mm).at[:B, :N].set(x.astype(mm))

    cost = pl.CostEstimate(
        flops=2 * Bp * Nhp * Np * Np + 2 * Bp * Nhp * Np,
        transcendentals=0,
        bytes_accessed=(x_p.size * mm_bytes + w_p.size * mm_bytes
                        + tri.size * mm_bytes + b_p.size * 4
                        + Bp * Nhp * Np * 4),
    )

    out_p = pl.pallas_call(
        _nade_layer_kernel,
        out_shape=jax.ShapeDtypeStruct((Bp, Nhp, Np), jnp.float32),
        grid=(Bp // TB,),
        in_specs=[
            pl.BlockSpec((TB, Np), lambda i: (i, 0)),     # x tile (pipelined)
            pl.BlockSpec((Nhp, Np), lambda i: (0, 0)),    # W (resident)
            pl.BlockSpec((Np, Np), lambda i: (0, 0)),     # prefix matrix (resident)
            pl.BlockSpec((Nhp, 1), lambda i: (0, 0)),     # bias (resident)
        ],
        out_specs=pl.BlockSpec((TB, Nhp, Np), lambda i: (i, 0, 0)),
        compiler_params=pltpu.CompilerParams(
            dimension_semantics=("parallel",),
            vmem_limit_bytes=budget,
        ),
        cost_estimate=cost,
    )(x_p, w_p, tri, b_p)

    # Slice away batch / sublane / lane padding.
    return out_p[:B, :Nh, :N]


def nade_layer_reference(x, w, b):
    """Pure-JAX transcription of the PyTorch NadeLayer.forward."""
    B, N = x.shape
    xr = jnp.broadcast_to(x[:, :, None], (B, N, N))
    xr = xr * jnp.triu(jnp.ones((N, N), x.dtype), k=1)[None, :, :]
    out = jnp.einsum('ij,kjl->kil', w, xr)
    return out + b.reshape(1, -1, 1)


if __name__ == "__main__":
    # NadeLayer(size_in=N, N_h); batch deliberately not a multiple of the tile.
    B, N, Nh = 12, 16, 32

    key = jax.random.PRNGKey(0)
    kx, kw, kb = jax.random.split(key, 3)

    # PyTorch init: uniform(-1/sqrt(fan_in), 1/sqrt(fan_in)), fan_in = size_in.
    bound = 1.0 / math.sqrt(N)
    w = jax.random.uniform(kw, (Nh, N), jnp.float32, -bound, bound)  # NadeLayer.weights
    b = jax.random.uniform(kb, (Nh,), jnp.float32, -bound, bound)    # NadeLayer.bias
    x = jax.random.normal(kx, (B, N), jnp.float32)

    ref = nade_layer_reference(x, w, b)

    # f32 MXU path (exact).
    prep32 = prepare_nade_params(w, b, use_bf16_matmul=False)
    out32 = jax.block_until_ready(nade_layer_forward(x, *prep32))
    assert out32.shape == (B, Nh, N)
    assert jnp.allclose(out32, ref, rtol=1e-5, atol=1e-5), "f32 kernel mismatch"

    # bf16 MXU path (default; f32 accumulation), looser tolerance.
    prep16 = prepare_nade_params(w, b, use_bf16_matmul=True)
    out16 = jax.block_until_ready(nade_layer_forward(x, *prep16))
    assert out16.shape == (B, Nh, N)
    assert jnp.allclose(out16, ref, rtol=2e-2, atol=2e-2), "bf16 kernel mismatch"

    print("KERNEL_OK")
</pallas_src>

<mosaic_0001>
module attributes {stable_mosaic.version = 11 : i64} {
  func.func @_nade_layer_kernel(%arg0: i32, %arg1: memref<8x128xf32, #tpu.memory_space<vmem>>, %arg2: memref<32x128xf32, #tpu.memory_space<vmem>>, %arg3: memref<128x128xf32, #tpu.memory_space<vmem>>, %arg4: memref<32x1xf32, #tpu.memory_space<vmem>>, %arg5: memref<8x32x128xf32, #tpu.memory_space<vmem>>) attributes {dimension_semantics = [#tpu.dimension_semantics<parallel>], iteration_bounds = array<i64: 2>, scalar_prefetch = 0 : i64, scratch_operands = 0 : i64, tpu.core_type = #tpu.core_type<tc>, window_params = [{transform_indices = @transform_0, window_bounds = array<i64: 8, 128>}, {pipeline_mode = #tpu.pipeline_mode<synchronous>, transform_indices = @transform_1, window_bounds = array<i64: 32, 128>}, {pipeline_mode = #tpu.pipeline_mode<synchronous>, transform_indices = @transform_2, window_bounds = array<i64: 128, 128>}, {pipeline_mode = #tpu.pipeline_mode<synchronous>, transform_indices = @transform_3, window_bounds = array<i64: 32, 1>}, {transform_indices = @transform_4, window_bounds = array<i64: 8, 32, 128>}]} {
    %c0 = arith.constant 0 : index
    %c0_0 = arith.constant 0 : index
    %0 = vector.load %arg1[%c0, %c0_0] : memref<8x128xf32, #tpu.memory_space<vmem>>, vector<8x128xf32>
    %c0_1 = arith.constant 0 : index
    %c0_2 = arith.constant 0 : index
    %1 = vector.load %arg2[%c0_1, %c0_2] : memref<32x128xf32, #tpu.memory_space<vmem>>, vector<32x128xf32>
    %c0_3 = arith.constant 0 : index
    %c0_4 = arith.constant 0 : index
    %2 = vector.load %arg3[%c0_3, %c0_4] : memref<128x128xf32, #tpu.memory_space<vmem>>, vector<128x128xf32>
    %c0_5 = arith.constant 0 : index
    %c0_6 = arith.constant 0 : index
    %3 = vector.load %arg4[%c0_5, %c0_6] : memref<32x1xf32, #tpu.memory_space<vmem>>, vector<32x1xf32>
    %4 = vector.shape_cast %0 : vector<8x128xf32> to vector<8x1x128xf32>
    %5 = vector.shape_cast %1 : vector<32x128xf32> to vector<1x32x128xf32>
    %6 = vector.broadcast %4 : vector<8x1x128xf32> to vector<8x32x128xf32>
    %7 = vector.broadcast %5 : vector<1x32x128xf32> to vector<8x32x128xf32>
    %8 = arith.mulf %6, %7 : vector<8x32x128xf32>
    %9 = vector.shape_cast %8 : vector<8x32x128xf32> to vector<256x128xf32>
    %cst = arith.constant dense<0.000000e+00> : vector<256x128xf32>
    %10 = tpu.matmul %9, %2, %cst {dimension_numbers = #tpu.dot_dimension_numbers<[1], [0], [0], [1], [0, 0, 1, 1], [], []>} : vector<256x128xf32>, vector<128x128xf32>, vector<256x128xf32> -> vector<256x128xf32>
    %11 = vector.shape_cast %10 : vector<256x128xf32> to vector<8x32x128xf32>
    %12 = vector.shape_cast %3 : vector<32x1xf32> to vector<1x32x1xf32>
    %13 = vector.broadcast %12 : vector<1x32x1xf32> to vector<8x32x128xf32>
    %14 = arith.addf %11, %13 : vector<8x32x128xf32>
    %c0_7 = arith.constant 0 : index
    %c0_8 = arith.constant 0 : index
    %c0_9 = arith.constant 0 : index
    %15 = vector.load %arg5[%c0_7, %c0_8, %c0_9] : memref<8x32x128xf32, #tpu.memory_space<vmem>>, vector<8x32x128xf32>
    tpu.vector_store %arg5[%c0_7, %c0_8, %c0_9], %14 {strides = array<i32>} : memref<8x32x128xf32, #tpu.memory_space<vmem>>, vector<8x32x128xf32>,
    return
  }
  func.func @transform_0(%arg0: i32) -> (i32, i32) {
    %c0_i32 = arith.constant 0 : i32
    %c0_i32_0 = arith.constant 0 : i32
    return %arg0, %c0_i32 : i32, i32
  }
  func.func @transform_1(%arg0: i32) -> (i32, i32) {
    %c0_i32 = arith.constant 0 : i32
    %c0_i32_0 = arith.constant 0 : i32
    %c0_i32_1 = arith.constant 0 : i32
    return %c0_i32, %c0_i32_0 : i32, i32
  }
  func.func @transform_2(%arg0: i32) -> (i32, i32) {
    %c0_i32 = arith.constant 0 : i32
    %c0_i32_0 = arith.constant 0 : i32
    %c0_i32_1 = arith.constant 0 : i32
    return %c0_i32, %c0_i32_0 : i32, i32
  }
  func.func @transform_3(%arg0: i32) -> (i32, i32) {
    %c0_i32 = arith.constant 0 : i32
    %c0_i32_0 = arith.constant 0 : i32
    %c0_i32_1 = arith.constant 0 : i32
    return %c0_i32, %c0_i32_0 : i32, i32
  }
  func.func @transform_4(%arg0: i32) -> (i32, i32, i32) {
    %c0_i32 = arith.constant 0 : i32
    %c0_i32_0 = arith.constant 0 : i32
    %c0_i32_1 = arith.constant 0 : i32
    return %arg0, %c0_i32, %c0_i32_0 : i32, i32, i32
  }
}

</mosaic_0001>

<bundles_post_ra>
// kernel: tpu_custom_call.1
= control target key start
LH: loop header
LB: loop body
LE: loop exit
PB: predicated region body
PF: predicated region fallthrough
CT: control target
= control target key end

     0   :  { %9 = vsyncpa [#allocation3], 0  ;;  %s1563_s0 = inlined_call_operand.hbm [shape: f32[16,128], index: 0, kind: input, shape index: {}]   ;;  %s1564_s1 = inlined_call_operand.vmem [shape: f32[32,128], index: 1, kind: input, shape index: {}]   ;;  %s1565_s2 = inlined_call_operand.hbm [shape: f32[128,128], index: 2, kind: input, shape index: {}]   ;;  %s1566_s3 = inlined_call_operand.vmem [shape: f32[32,1], index: 3, kind: input, shape index: {}]   ;;  %s1567_s4 = inlined_call_operand.hbm [shape: f32[16,32,128], index: 4, kind: output, shape index: {}]  }
   0x1   :  { %11 = vsyncpa [#allocation3 + $0x1], 0 }
   0x2   :  { %12 = vsyncpa [#allocation6], 0 }
   0x3   :  { %13 = vsyncpa [#allocation4], 0 }
   0x4   :  { %15 = vsyncpa [#allocation4 + $0x1], 0  ;;  %s1207_s15 = smov 0   ;;  %s1209_s16 = smov 0  }
   0x5   :  { %s1211_s17 = smov 0   ;;  %s1213_s18 = smov 0  }
   0x6 LB: > { %s1228_s19 = sadd.s32 4294967295, %s1171_s18   ;;  %s783_s20 = sadd.s32 4294967294, %s1171_s18   ;;  %s1171_s18 = sphi %s1213_s18, %s1587_s18   ;;  %s1167_s17 = sphi %s1211_s17, %s1586_s17   ;;  %s1163_s16 = sphi %s1209_s16, %s1585_s16   ;;  %s1159_s15 = sphi %s1207_s15, %s1584_s15  }
   0x7   : > { %p41_p0 = scmp.ne.s32.totalorder %s1163_s16, %s1159_s15  ;;  %p1568_p1 = scmp.eq.s32.totalorder %s1228_s19, 0 }
   0x8   : > { %p134_p3 = scmp.eq.s32.totalorder %s783_s20, 1  ;;  %p784_p5 = scmp.ge.s32.totalorder %s1171_s18, 1 }
   0x9   : > { %p1237_p4 = por %p1568_p1, %p41_p0  ;;  %p141_p7 = scmp.lt.s32.totalorder %s1171_s18, 3 }
   0xa   : > { %p1242_p6 = por %p134_p3, %p41_p0  ;;  %s1173_s24 = smov [#allocation5]  }
   0xb   : > { %s1571_s21 = scalar_select %p1237_p4, 1, 0 }
   0xc   : > { %s1572_s22 = scalar_select %p1242_p6, 1, 0 }
   0xd   : > { %p1247_p8 = pnand %p784_p5, %p141_p7  ;;  %s156_s25 = sshll.u32 %s1173_s24, 4  ;;  %s1251_s25 = int_to_ptr.vmem [resolvable:$true] %s156_s25 }
   0xe   : > { %s1263_s27 = sadd.s32 1, %s1171_s18   ;;  %s28_s28 = sadd.s32 1, %s1167_s17 }
   0xf   : > { %s1573_s23 = scalar_select %p1247_p8, 1, 0 }
  0x10   : > { %p985_p9 = pneg %p1247_p8  ;;  %s25_s29 = ssub.s32 %s1171_s18, %s1263_s27 }
  0x11   : > { %s1043_s6 = scalar_lea.hbm %s1565_s2, 2048 }
  0x12   : > { %p1258_p11 = pnand %p985_p9, %p1568_p1  ;;  %p1044_p12 = scmp.ne.s32.totalorder %s1565_s2, %s1043_s6 }
  0x13   : > { %p1050_p5 = scmp.lt.u32.totalorder %s1043_s6, %s1565_s2 }
  0x14   : > { %p1045_p13 = pneg %p1258_p11 }
  0x16   : > { %p1046_p0 = pnand %p1045_p13, %p1044_p12 }
  0x18   : > { %p1047_p3 = pneg %p1046_p0 }
  0x1a   : > { %p1052_p7 = pnand %p1050_p5, %p1047_p3 }
  0x1c   : > { %1055 = shalt.err (!%p1052_p7)
}
  0x1d   : > { %s1056_s11 = scalar_lea.vmem %s1251_s25, 2048  ;;  %p1064_p2 = scmp.lt.s32.totalorder %s1251_s25, %s1251_s25 }
  0x1e   : > { %p1057_p9 = scmp.ne.s32.totalorder %s1251_s25, %s1056_s11  ;;  %p1065_p6 = scmp.lt.s32.totalorder %s1056_s11, %s1056_s11 }
  0x20   : > { %p1059_p10 = pnand %p1057_p9, %p1045_p13  ;;  %p1066_p4 = por %p1065_p6, %p1064_p2 }
  0x22   : > { %p1060_p1 = pneg %p1059_p10 }
  0x24   : > { %p1067_p8 = pnand %p1066_p4, %p1060_p1 }
  0x26   : > { %1070 = shalt.err (!%p1067_p8)
}
  0x27   : > { %s1174_s12 = smov 128   ;;  %s1175_s13 = smov 8  }
  0x28   : > { %988 = dma.hbm_to_vmem [thread:$0]  (!%p1258_p11), %s1565_s2, 2048, %s1251_s25, [#allocation6], %s1174_s12, %s1174_s12, %s1175_s13  }
  0x29   : > { %p26_p2 = scmp.eq.s32.totalorder %s25_s29, 0  ;;  %p35_p1 = scmp.ne.s32.totalorder %s1167_s17, %s1163_s16 }
  0x2a   : > { %p36_p4 = scmp.eq.s32.totalorder %s1171_s18, 0  ;;  %p998_p6 = scmp.lt.s32.totalorder %s1171_s18, 2 }
  0x2b   : > { %s1294_s24 = scalar_select %p26_p2, %s1167_s17, %s28_s28  }
  0x2c   : > { %p37_p8 = por %p36_p4, %p35_p1  ;;  %p1575_p10 = scmp.eq.s32.totalorder %s1228_s19, 1 }
  0x2d   : > { %s173_s5 = sand.u32 1, %s1167_s17   ;;  %s788_s6 = sshll.u32 %s1171_s18, 7 }
  0x2e   : > { %p1298_p12 = por %p1575_p10, %p35_p1  ;;  %s787_s7 = sshll.u32 %s173_s5, 3 }
  0x2f   : > { %s1307_s9 = scalar_lea.hbm %s1563_s0, %s788_s6  ;;  %s177_s25 = scalar_lea.vmem [#allocation2], %s787_s7 }
  0x30   : > { %s184_s28 = sshll.u32 %s177_s25, 4  ;;  %p1309_p11 = pnand %p998_p6, %p37_p8  ;;  %s1313_s28 = int_to_ptr.vmem [resolvable:$true] %s184_s28 }
  0x31   : > { %s174_s10 = scalar_lea.sflag [#allocation3], %s173_s5  ;;  %s1071_s11 = scalar_lea.hbm %s1307_s9, 128 }
  0x32   : > { %p1072_p13 = scmp.ne.s32.totalorder %s1307_s9, %s1071_s11  ;;  %p1073_p0 = pneg %p1309_p11 }
  0x33   : > { %s1076_s14 = scalar_lea.hbm %s1563_s0, 256  ;;  %p1077_p7 = scmp.lt.u32.totalorder %s1307_s9, %s1563_s0 }
  0x34   : > { %p1074_p3 = pnand %p1073_p0, %p1072_p13  ;;  %p1078_p9 = scmp.lt.u32.totalorder %s1076_s14, %s1071_s11 }
  0x35   : > { %p1080_p1 = scmp.lt.u32.totalorder %s1071_s11, %s1307_s9 }
  0x36   : > { %p1075_p5 = pneg %p1074_p3  ;;  %p1079_p2 = por %p1078_p9, %p1077_p7 }
  0x38   : > { %p1081_p4 = por %p1080_p1, %p1079_p2 }
  0x3a   : > { %p1082_p6 = pnand %p1081_p4, %p1075_p5 }
  0x3c   : > { %1085 = shalt.err (!%p1082_p6)
}
  0x3d   : > { %s1086_s5 = scalar_lea.vmem %s1313_s28, 128  ;;  %s1176_s7 = smov [#allocation2]  }
  0x3e   : > { %p1087_p8 = scmp.ne.s32.totalorder %s1313_s28, %s1086_s5  ;;  %s1091_s26 = sshll.u32 %s1176_s7, 4  ;;  %s1092_s26 = int_to_ptr.vmem [resolvable:$false] %s1091_s26 }
  0x3f   : > { %s1093_s8 = scalar_lea.vmem %s1092_s26, 256  ;;  %p1094_p3 = scmp.lt.s32.totalorder %s1313_s28, %s1092_s26 }
  0x40   : > { %p1089_p10 = pnand %p1087_p8, %p1073_p0  ;;  %p1095_p7 = scmp.lt.s32.totalorder %s1093_s8, %s1086_s5 }
  0x42   : > { %p1090_p13 = pneg %p1089_p10  ;;  %p1096_p9 = por %p1095_p7, %p1094_p3 }
  0x44   : > { %p1097_p2 = pnand %p1096_p9, %p1090_p13 }
  0x46   : > { %1100 = shalt.err (!%p1097_p2)
}
  0x47   : > { %992 = dma.hbm_to_vmem [thread:$0]  (!%p1309_p11), %s1307_s9, 128, %s1313_s28, %s174_s10  }
  0x48   : > { %p1578_p5 = scmp.ne.s32.totalorder %s1573_s23, 0 }
  0x49   : > { %s1343_s25 = sand.u32 (!%p1578_p5), 1, %s1163_s16   ;;  %p1579_p0 = scmp.ne.s32.totalorder (!%p1578_p5), %s1571_s21, 0 }
  0x4a   : > { %193 = sbr.rel (%p1578_p5) target bundleno = 378 (0x17a), region = 36  ;;  %s790_s11 = sshll.u32 (!%p1578_p5), %s1343_s25, 3 }
  0x4b   : > { %s196_s12 = scalar_lea.sflag (!%p1578_p5), [#allocation3], %s1343_s25  ;;  %s199_s13 = scalar_lea.vmem (!%p1578_p5), [#allocation2], %s790_s11 }
  0x51   : > { %1146 = dma.done.wait (%p1579_p0), %s196_s12, 128  }
  0x52   : > { %1148 = vsyncadd (%p1579_p0), %s196_s12, 4294967168  ;;  %p1580_p1 = scmp.eq.s32.totalorder %s1228_s19, 0 }
  0x54   : > { %1150 = dma.done.wait (%p1580_p1), [#allocation6], 2048   ;;  %p1581_p11 = pmov %p1580_p1 }
  0x55   : > { %v1177_v0 = vmov 1966171168   ;;  %v259_v2 = vlaneseq  ;;  %v1178_v3 = vmov 0   ;;  %v234_v6 = vld [vmem:[#allocation5] sm:$0xff]  ;;  %v235_v7 = vld [vmem:[#allocation5 + $0x8] sm:$0xff]  ;;  %v236_v8 = vld [vmem:[#allocation5 + $0x10] sm:$0xff] }
  0x56   : > { %1152 = vsyncadd (%p1581_p11), [#allocation6], 4294965248  ;;  %v257_v1 = vunpack.c.l.s4 %v1177_v0  ;;  %1040 = vset.pattern.permute.xlu0 %v1178_v3  ;;  %1041 = vset.pattern.permute.xlu1 %v1178_v3  ;;  %v929_v9 = vpack.c.bf16 %v235_v7, %v234_v6  ;;  %v237_v10 = vld [vmem:[#allocation5 + $0x18] sm:$0xff]  ;;  %v238_v12 = vld [vmem:[#allocation5 + $0x20] sm:$0xff]  ;;  %s792_s21 = sshll.u32 %s1343_s25, 8  ;;  %s800_s9 = sshll.u32 %s1228_s19, 12 }
  0x57   : > { %v260_v5 = vshrl.u32 %v259_v2, 7  ;;  %v933_v11 = vpack.c.bf16 %v237_v10, %v236_v8  ;;  %v239_v13 = vld [vmem:[#allocation5 + $0x28] sm:$0xff]  ;;  %v229_v16 = vld [vmem:[%s199_s13] sm:$0xff]  ;;  %v252_v25 = vld [vmem:[%s1566_s3 + $0x10] sm:$0xff]  ;;  %s1450_s23 = scalar_lea.vmem [#allocation7], %s792_s21  ;;  %s1511_s10 = scalar_lea.hbm %s1567_s4, %s800_s9 }
  0x58   : > { %v258_v4 = vunpack.c.0.s8 %v257_v1  ;;  %930 = vmatprep.subr.bf16.mxu0 %v929_v9  ;;  %961 = vmatprep.subr.bf16.mxu1 %v929_v9  ;;  %v937_v15 = vpack.c.bf16 %v239_v13, %v238_v12  ;;  %v240_v17 = vld [vmem:[#allocation5 + $0x30] sm:$0xff]  ;;  %v241_v18 = vld [vmem:[#allocation5 + $0x38] sm:$0xff]  ;;  %v255_v21 = vcombine.high %v229_v16, %v229_v16  ;;  %v242_v28 = vld [vmem:[#allocation5 + $0x40] sm:$0xff]  ;;  %s700_s28 = sshll.u32 %s1450_s23, 4  ;;  %s686_s14 = scalar_lea.sflag [#allocation4], %s1343_s25  ;;  %s1513_s28 = int_to_ptr.vmem [resolvable:$true] %s700_s28 }
  0x59   : > { %932 = vmatpush3.bf16.msra.mxu0 %v929_v9  ;;  %969 = vmatpush3.bf16.msra.mxu1 %v929_v9  ;;  %v1358_v20 = vsub.s32 0, %v260_v5  ;;  %v250_v22 = vld [vmem:[%s1566_s3] sm:$0xff]  ;;  %v941_v26 = vpack.c.bf16 %v241_v18, %v240_v17  ;;  %v243_v29 = vld [vmem:[#allocation5 + $0x48] sm:$0xff]  ;;  %v251_v34 = vld [vmem:[%s1566_s3 + $0x8] sm:$0xff]  ;;  %s1101_s20 = scalar_lea.vmem %s1513_s28, 4096  ;;  %s1179_s6 = smov [#allocation7]  }
  0x5a   : > { %v1355_v14 = vsub.s32 %v258_v4, %v260_v5  ;;  %934 = vmatprep.subr.bf16.mxu0 %v933_v11  ;;  %962 = vmatprep.subr.bf16.mxu1 %v933_v11  ;;  %v1373_v27 = vld [vmem:[%s1564_s1] sm:$0xff]  ;;  %v945_v35 = vpack.c.bf16 %v243_v29, %v242_v28  ;;  %v245_v37 = vld [vmem:[#allocation5 + $0x58] sm:$0xff]  ;;  %v253_v39 = vld [vmem:[%s1566_s3 + $0x18] sm:$0xff]  ;;  %p1102_p4 = scmp.ne.s32.totalorder %s1513_s28, %s1101_s20  ;;  %s1105_s5 = sshll.u32 %s1179_s6, 4  ;;  %s1106_s5 = int_to_ptr.vmem [resolvable:$false] %s1105_s5 }
  0x5b   : > { %603 = vperm.xlu0 %1040, %v250_v22   ;;  %613 = vperm.xlu1 %1041, %v252_v25   ;;  %v244_v36 = vld [vmem:[#allocation5 + $0x50] sm:$0xff]  ;;  %v246_v41 = vld [vmem:[#allocation5 + $0x60] sm:$0xff]  ;;  %v247_v42 = vld [vmem:[#allocation5 + $0x68] sm:$0xff]  ;;  %s1107_s7 = scalar_lea.vmem %s1106_s5, 8192  ;;  %p1108_p10 = scmp.lt.s32.totalorder %s1513_s28, %s1106_s5 }
  0x5c   : > { %v262_v19 = vrot.slane %v229_v16, %v1355_v14  ;;  %v269_v24 = vrot.slane %v255_v21, %v1355_v14  ;;  %v949_v40 = vpack.c.bf16 %v245_v37, %v244_v36  ;;  %v953_v43 = vpack.c.bf16 %v247_v42, %v246_v41  ;;  %v248_v44 = vld [vmem:[#allocation5 + $0x70] sm:$0xff]  ;;  %v249_v45 = vld [vmem:[#allocation5 + $0x78] sm:$0xff]  ;;  %v1398_v50 = vld [vmem:[%s1564_s1 + $0x10] sm:$0xff]  ;;  %p1103_p6 = pnand %p1102_p4, %p1298_p12  ;;  %p1109_p13 = scmp.lt.s32.totalorder %s1107_s7, %s1101_s20 }
  0x5d   : > { %936 = vmatpush3.bf16.msra.mxu0 %v933_v11  ;;  %970 = vmatpush3.bf16.msra.mxu1 %v933_v11  ;;  %v957_v48 = vpack.c.bf16 %v249_v45, %v248_v44  ;;  %v1393_v49 = vld [vmem:[%s1564_s1 + $0x8] sm:$0xff]  ;;  %v233_v57 = vld [vmem:[%s1564_s1 + $0x18] sm:$0xff] }
  0x5e   : > { %v1364_v23 = vrot.slane %v262_v19, %v1355_v14  ;;  %938 = vmatprep.subr.bf16.mxu0 %v937_v15  ;;  %963 = vmatprep.subr.bf16.mxu1 %v937_v15  ;;  %v1378_v31 = vrot.slane %v269_v24, %v1355_v14  ;;  %v270_v46 = vcombine.high %v262_v19, %v262_v19  ;;  %p1104_p8 = pneg %p1103_p6  ;;  %p1110_p3 = por %p1109_p13, %p1108_p10 }
  0x5f   : > { %608 = vperm.xlu0 %1040, %v251_v34   ;;  %618 = vperm.xlu1 %1041, %v253_v39   ;;  %v271_v47 = vcombine.high %v269_v24, %v269_v24 }
  0x60   : > { %v307_v30 = vrot.slane %v1364_v23, %v1358_v20  ;;  %v323_v33 = vrot.slane %v1378_v31, %v1358_v20  ;;  %v292_v51 = vrot.slane %v270_v46, %v1355_v14  ;;  %v300_v60 = vcombine.high %v1364_v23, %v1364_v23  ;;  %p1111_p7 = pnand %p1110_p3, %p1104_p8 }
  0x61   : > { %940 = vmatpush3.bf16.msra.mxu0 %v937_v15  ;;  %971 = vmatpush3.bf16.msra.mxu1 %v937_v15  ;;  %v299_v52 = vrot.slane %v271_v47, %v1355_v14  ;;  %v301_v63 = vcombine.high %v1378_v31, %v1378_v31 }
  0x62   : > { %v344_v32 = vmul.f32 %v307_v30, %v1373_v27  ;;  %942 = vmatprep.subr.bf16.mxu0 %v941_v26  ;;  %964 = vmatprep.subr.bf16.mxu1 %v941_v26  ;;  %v360_v38 = vmul.f32 %v323_v33, %v1373_v27  ;;  %v345_v53 = vmul.f32 %v307_v30, %v1393_v49 }
  0x63   : > { %v361_v54 = vmul.f32 %v323_v33, %v1393_v49  ;;  %v346_v55 = vmul.f32 %v307_v30, %v1398_v50  ;;  %v362_v56 = vmul.f32 %v323_v33, %v1398_v50  ;;  %v311_v58 = vrot.slane %v292_v51, %v1358_v20 }
  0x64   : > { %881 = vmatprep.mubr.f32.mxu0 %v344_v32  ;;  %905 = vmatprep.mubr.f32.mxu1 %v360_v38  ;;  %v327_v59 = vrot.slane %v299_v52, %v1358_v20  ;;  %v347_v61 = vmul.f32 %v307_v30, %v233_v57  ;;  %v363_v62 = vmul.f32 %v323_v33, %v233_v57 }
  0x65   : > { %944 = vmatpush3.bf16.msra.mxu0 %v941_v26  ;;  %972 = vmatpush3.bf16.msra.mxu1 %v941_v26  ;;  %v348_v0 = vmul.f32 %v311_v58, %v1373_v27  ;;  %v349_v2 = vmul.f32 %v311_v58, %v1393_v49  ;;  %v315_v4 = vrot.slane %v300_v60, %v1358_v20 }
  0x66   : > { %946 = vmatprep.subr.bf16.mxu0 %v945_v35  ;;  %965 = vmatprep.subr.bf16.mxu1 %v945_v35  ;;  %v364_v1 = vmul.f32 %v327_v59, %v1373_v27  ;;  %v365_v3 = vmul.f32 %v327_v59, %v1393_v49  ;;  %v350_v5 = vmul.f32 %v311_v58, %v1398_v50 }
  0x67   : > { %v366_v6 = vmul.f32 %v327_v59, %v1398_v50  ;;  %v331_v7 = vrot.slane %v301_v63, %v1358_v20  ;;  %v351_v8 = vmul.f32 %v311_v58, %v233_v57  ;;  %v367_v9 = vmul.f32 %v327_v59, %v233_v57 }
  0x68   : > { %v302_v10 = vcombine.high %v292_v51, %v292_v51  ;;  %v352_v11 = vmul.f32 %v315_v4, %v1373_v27  ;;  %v303_v13 = vcombine.high %v299_v52, %v299_v52  ;;  %v353_v14 = vmul.f32 %v315_v4, %v1393_v49 }
  0x69   : > { %948 = vmatpush3.bf16.msra.mxu0 %v945_v35  ;;  %973 = vmatpush3.bf16.msra.mxu1 %v945_v35  ;;  %v368_v12 = vmul.f32 %v331_v7, %v1373_v27  ;;  %v369_v15 = vmul.f32 %v331_v7, %v1393_v49  ;;  %v354_v16 = vmul.f32 %v315_v4, %v1398_v50 }
  0x6a   : > { %950 = vmatprep.subr.bf16.mxu0 %v949_v40  ;;  %966 = vmatprep.subr.bf16.mxu1 %v949_v40  ;;  %v370_v17 = vmul.f32 %v331_v7, %v1398_v50  ;;  %v319_v18 = vrot.slane %v302_v10, %v1358_v20  ;;  %v335_v19 = vrot.slane %v303_v13, %v1358_v20 }
  0x6b   : > { %v355_v21 = vmul.f32 %v315_v4, %v233_v57  ;;  %v371_v22 = vmul.f32 %v331_v7, %v233_v57 }
  0x6c   : > { %v356_v23 = vmul.f32 %v319_v18, %v1373_v27  ;;  %v372_v24 = vmul.f32 %v335_v19, %v1373_v27  ;;  %v357_v25 = vmul.f32 %v319_v18, %v1393_v49  ;;  %v373_v26 = vmul.f32 %v335_v19, %v1393_v49 }
  0x6d   : > { %952 = vmatpush3.bf16.msra.mxu0 %v949_v40  ;;  %974 = vmatpush3.bf16.msra.mxu1 %v949_v40  ;;  %v358_v20 = vmul.f32 %v319_v18, %v1398_v50  ;;  %v374_v28 = vmul.f32 %v335_v19, %v1398_v50  ;;  %v359_v29 = vmul.f32 %v319_v18, %v233_v57 }
  0x6e   : > { %954 = vmatprep.subr.bf16.mxu0 %v953_v43  ;;  %967 = vmatprep.subr.bf16.mxu1 %v953_v43  ;;  %v375_v30 = vmul.f32 %v335_v19, %v233_v57 }
  0x71   : > { %956 = vmatpush3.bf16.msra.mxu0 %v953_v43  ;;  %975 = vmatpush3.bf16.msra.mxu1 %v953_v43 }
  0x72   : > { %958 = vmatprep.subr.bf16.mxu0 %v957_v48  ;;  %968 = vmatprep.subr.bf16.mxu1 %v957_v48 }
  0x75   : > { %960 = vmatpush3.bf16.msra.mxu0 %v957_v48  ;;  %976 = vmatpush3.bf16.msra.mxu1 %v957_v48 }
  0x78   : > { %882 = vmatmul.mubr.f32.vlgmr.msra.gmra.mrb[0].mxu0 %v345_v53  ;;  %906 = vmatmul.mubr.f32.vlgmr.msra.gmra.mrb[0].mxu1 %v361_v54 }
  0x79   : > { %884 = vmatprep.mubr.f32.mxu0 %v346_v55  ;;  %908 = vmatprep.mubr.f32.mxu1 %v362_v56 }
  0x7c   : > { %885 = vmatmul.mubr.f32.gmra.mrb[2].mxu0 %v347_v61  ;;  %909 = vmatmul.mubr.f32.gmra.mrb[2].mxu1 %v363_v62 }
  0x7d   : > { %887 = vmatprep.mubr.f32.mxu0 %v348_v0  ;;  %911 = vmatprep.mubr.f32.mxu1 %v364_v1 }
  0x80   : > { %888 = vmatmul.mubr.f32.gmra.mrb[4].mxu0 %v349_v2  ;;  %912 = vmatmul.mubr.f32.gmra.mrb[4].mxu1 %v365_v3 }
  0x81   : > { %890 = vmatprep.mubr.f32.mxu0 %v350_v5  ;;  %914 = vmatprep.mubr.f32.mxu1 %v366_v6 }
  0x84   : > { %891 = vmatmul.mubr.f32.gmra.mrb[6].mxu0 %v351_v8  ;;  %915 = vmatmul.mubr.f32.gmra.mrb[6].mxu1 %v367_v9 }
  0x85   : > { %893 = vmatprep.mubr.f32.mxu0 %v352_v11  ;;  %917 = vmatprep.mubr.f32.mxu1 %v368_v12 }
  0x88   : > { %894 = vmatmul.mubr.f32.gmra.mrb[8].mxu0 %v353_v14  ;;  %918 = vmatmul.mubr.f32.gmra.mrb[8].mxu1 %v369_v15 }
  0x89   : > { %896 = vmatprep.mubr.f32.mxu0 %v354_v16  ;;  %920 = vmatprep.mubr.f32.mxu1 %v370_v17 }
  0x8c   : > { %897 = vmatmul.mubr.f32.gmra.mrb[10].mxu0 %v355_v21  ;;  %921 = vmatmul.mubr.f32.gmra.mrb[10].mxu1 %v371_v22 }
  0x8d   : > { %899 = vmatprep.mubr.f32.mxu0 %v356_v23  ;;  %923 = vmatprep.mubr.f32.mxu1 %v372_v24 }
  0x90   : > { %900 = vmatmul.mubr.f32.gmra.mrb[12].mxu0 %v357_v25  ;;  %924 = vmatmul.mubr.f32.gmra.mrb[12].mxu1 %v373_v26 }
  0x91   : > { %902 = vmatprep.mubr.f32.mxu0 %v358_v20  ;;  %926 = vmatprep.mubr.f32.mxu1 %v374_v28 }
  0x94   : > { %903 = vmatmul.mubr.f32.gmra.mrb[14].mxu0 %v359_v29  ;;  %927 = vmatmul.mubr.f32.gmra.mrb[14].mxu1 %v375_v30 }
  0xda   : > { %v1437_v27 = vpop.permute.xlu0 %603  ;;  %v1439_v31 = vpop.permute.xlu1 %613 }
  0xde   : > { %v1442_v32 = vpop.permute.xlu0 %608  ;;  %v1448_v41 = vpop.permute.xlu1 %618 }
 0x14b   : > { %v883_v33 = vpop.f32.mrb[0].mxu0  ;;  %v907_v34 = vpop.f32.mrb[0].mxu1 }
 0x14c   : > { %v622_v35 = vadd.f32 %v883_v33, %v1442_v32  ;;  %v638_v36 = vadd.f32 %v907_v34, %v1442_v32  ;;  %v442_v37 = vpop.f32.mrb[1].mxu0  ;;  %v522_v38 = vpop.f32.mrb[1].mxu1 }
 0x14d   : > { %v621_v39 = vadd.f32 %v1437_v27, %v442_v37  ;;  %v637_v40 = vadd.f32 %v1437_v27, %v522_v38 }
 0x14e   : > { %654 = vst [vmem:[%s1450_s23 + $0x8] sm:$0xff] %v622_v35  ;;  %670 = vst [vmem:[%s1450_s23 + $0x88] sm:$0xff] %v638_v36 }
 0x14f   : > { %653 = vst [vmem:[%s1450_s23] sm:$0xff] %v621_v39  ;;  %669 = vst [vmem:[%s1450_s23 + $0x80] sm:$0xff] %v637_v40  ;;  %v886_v42 = vpop.f32.mrb[2].mxu0  ;;  %v910_v43 = vpop.f32.mrb[2].mxu1 }
 0x150   : > { %v624_v44 = vadd.f32 %v886_v42, %v1448_v41  ;;  %v640_v45 = vadd.f32 %v910_v43, %v1448_v41  ;;  %v452_v46 = vpop.f32.mrb[3].mxu0  ;;  %v532_v47 = vpop.f32.mrb[3].mxu1 }
 0x151   : > { %v623_v48 = vadd.f32 %v1439_v31, %v452_v46  ;;  %v639_v49 = vadd.f32 %v1439_v31, %v532_v47 }
 0x152   : > { %656 = vst [vmem:[%s1450_s23 + $0x18] sm:$0xff] %v624_v44  ;;  %672 = vst [vmem:[%s1450_s23 + $0x98] sm:$0xff] %v640_v45 }
 0x153   : > { %655 = vst [vmem:[%s1450_s23 + $0x10] sm:$0xff] %v623_v48  ;;  %671 = vst [vmem:[%s1450_s23 + $0x90] sm:$0xff] %v639_v49  ;;  %v889_v50 = vpop.f32.mrb[4].mxu0  ;;  %v913_v51 = vpop.f32.mrb[4].mxu1 }
 0x154   : > { %v626_v52 = vadd.f32 %v889_v50, %v1442_v32  ;;  %v642_v53 = vadd.f32 %v913_v51, %v1442_v32  ;;  %v462_v54 = vpop.f32.mrb[5].mxu0  ;;  %v542_v55 = vpop.f32.mrb[5].mxu1 }
 0x155   : > { %v625_v56 = vadd.f32 %v1437_v27, %v462_v54  ;;  %v641_v57 = vadd.f32 %v1437_v27, %v542_v55 }
 0x156   : > { %658 = vst [vmem:[%s1450_s23 + $0x28] sm:$0xff] %v626_v52  ;;  %674 = vst [vmem:[%s1450_s23 + $0xa8] sm:$0xff] %v642_v53 }
 0x157   : > { %657 = vst [vmem:[%s1450_s23 + $0x20] sm:$0xff] %v625_v56  ;;  %673 = vst [vmem:[%s1450_s23 + $0xa0] sm:$0xff] %v641_v57  ;;  %v892_v58 = vpop.f32.mrb[6].mxu0  ;;  %v916_v59 = vpop.f32.mrb[6].mxu1 }
 0x158   : > { %v628_v60 = vadd.f32 %v892_v58, %v1448_v41  ;;  %v644_v61 = vadd.f32 %v916_v59, %v1448_v41  ;;  %v472_v62 = vpop.f32.mrb[7].mxu0  ;;  %v552_v63 = vpop.f32.mrb[7].mxu1 }
 0x159   : > { %v627_v0 = vadd.f32 %v1439_v31, %v472_v62  ;;  %v643_v1 = vadd.f32 %v1439_v31, %v552_v63 }
 0x15a   : > { %660 = vst [vmem:[%s1450_s23 + $0x38] sm:$0xff] %v628_v60  ;;  %676 = vst [vmem:[%s1450_s23 + $0xb8] sm:$0xff] %v644_v61 }
 0x15b   : > { %659 = vst [vmem:[%s1450_s23 + $0x30] sm:$0xff] %v627_v0  ;;  %675 = vst [vmem:[%s1450_s23 + $0xb0] sm:$0xff] %v643_v1  ;;  %v895_v2 = vpop.f32.mrb[8].mxu0  ;;  %v919_v3 = vpop.f32.mrb[8].mxu1 }
 0x15c   : > { %v630_v4 = vadd.f32 %v895_v2, %v1442_v32  ;;  %v646_v5 = vadd.f32 %v919_v3, %v1442_v32  ;;  %v482_v6 = vpop.f32.mrb[9].mxu0  ;;  %v562_v7 = vpop.f32.mrb[9].mxu1 }
 0x15d   : > { %v629_v8 = vadd.f32 %v1437_v27, %v482_v6  ;;  %v645_v9 = vadd.f32 %v1437_v27, %v562_v7 }
 0x15e   : > { %662 = vst [vmem:[%s1450_s23 + $0x48] sm:$0xff] %v630_v4  ;;  %678 = vst [vmem:[%s1450_s23 + $0xc8] sm:$0xff] %v646_v5 }
 0x15f   : > { %661 = vst [vmem:[%s1450_s23 + $0x40] sm:$0xff] %v629_v8  ;;  %677 = vst [vmem:[%s1450_s23 + $0xc0] sm:$0xff] %v645_v9  ;;  %v898_v10 = vpop.f32.mrb[10].mxu0  ;;  %v922_v11 = vpop.f32.mrb[10].mxu1 }
 0x160   : > { %v632_v12 = vadd.f32 %v898_v10, %v1448_v41  ;;  %v648_v13 = vadd.f32 %v922_v11, %v1448_v41  ;;  %v492_v14 = vpop.f32.mrb[11].mxu0  ;;  %v572_v15 = vpop.f32.mrb[11].mxu1 }
 0x161   : > { %v631_v16 = vadd.f32 %v1439_v31, %v492_v14  ;;  %v647_v17 = vadd.f32 %v1439_v31, %v572_v15 }
 0x162   : > { %664 = vst [vmem:[%s1450_s23 + $0x58] sm:$0xff] %v632_v12  ;;  %680 = vst [vmem:[%s1450_s23 + $0xd8] sm:$0xff] %v648_v13 }
 0x163   : > { %663 = vst [vmem:[%s1450_s23 + $0x50] sm:$0xff] %v631_v16  ;;  %679 = vst [vmem:[%s1450_s23 + $0xd0] sm:$0xff] %v647_v17  ;;  %v901_v18 = vpop.f32.mrb[12].mxu0  ;;  %v925_v19 = vpop.f32.mrb[12].mxu1 }
 0x164   : > { %v634_v21 = vadd.f32 %v901_v18, %v1442_v32  ;;  %v650_v22 = vadd.f32 %v925_v19, %v1442_v32  ;;  %v502_v23 = vpop.f32.mrb[13].mxu0  ;;  %v582_v24 = vpop.f32.mrb[13].mxu1 }
 0x165   : > { %v633_v25 = vadd.f32 %v1437_v27, %v502_v23  ;;  %v649_v26 = vadd.f32 %v1437_v27, %v582_v24 }
 0x166   : > { %666 = vst [vmem:[%s1450_s23 + $0x68] sm:$0xff] %v634_v21  ;;  %682 = vst [vmem:[%s1450_s23 + $0xe8] sm:$0xff] %v650_v22 }
 0x167   : > { %665 = vst [vmem:[%s1450_s23 + $0x60] sm:$0xff] %v633_v25  ;;  %681 = vst [vmem:[%s1450_s23 + $0xe0] sm:$0xff] %v649_v26  ;;  %v904_v20 = vpop.f32.mrb[14].mxu0  ;;  %v928_v28 = vpop.f32.mrb[14].mxu1 }
 0x168   : > { %v636_v29 = vadd.f32 %v904_v20, %v1448_v41  ;;  %v652_v30 = vadd.f32 %v928_v28, %v1448_v41  ;;  %v512_v32 = vpop.f32.mrb[15].mxu0  ;;  %v592_v27 = vpop.f32.mrb[15].mxu1 }
 0x169   : > { %v635_v33 = vadd.f32 %v1439_v31, %v512_v32  ;;  %v651_v34 = vadd.f32 %v1439_v31, %v592_v27 }
 0x16a   : > { %668 = vst [vmem:[%s1450_s23 + $0x78] sm:$0xff] %v636_v29  ;;  %684 = vst [vmem:[%s1450_s23 + $0xf8] sm:$0xff] %v652_v30 }
 0x16b   : > { %667 = vst [vmem:[%s1450_s23 + $0x70] sm:$0xff] %v635_v33  ;;  %683 = vst [vmem:[%s1450_s23 + $0xf0] sm:$0xff] %v651_v34 }
 0x16c   : > { %1114 = shalt.err (!%p1111_p7)
}
 0x16d   : > { %s1115_s26 = scalar_lea.hbm %s1511_s10, 4096  ;;  %s1119_s12 = scalar_lea.hbm %s1567_s4, 8192 }
 0x16e   : > { %p1116_p9 = scmp.ne.s32.totalorder %s1511_s10, %s1115_s26  ;;  %p1120_p0 = scmp.lt.u32.totalorder %s1511_s10, %s1567_s4 }
 0x16f   : > { %p1121_p1 = scmp.lt.u32.totalorder %s1119_s12, %s1115_s26  ;;  %p1123_p4 = scmp.lt.u32.totalorder %s1115_s26, %s1511_s10 }
 0x170   : > { %p1117_p2 = pnand %p1116_p9, %p1298_p12 }
 0x171   : > { %p1122_p11 = por %p1121_p1, %p1120_p0 }
 0x172   : > { %p1118_p5 = pneg %p1117_p2 }
 0x173   : > { %p1124_p6 = por %p1123_p4, %p1122_p11 }
 0x175   : > { %p1125_p8 = pnand %p1124_p6, %p1118_p5 }
 0x177   : > { %1128 = shalt.err (!%p1125_p8)
}
 0x178   : > { %s1180_s23 = smov 128   ;;  %s1181_s9 = smov 8  }
 0x179   : > { %983 = dma.vmem_to_hbm [thread:$0]  (%p1298_p12), %s1513_s28, 4096, %s1511_s10, %s686_s14, %s1180_s23, %s1180_s23, %s1181_s9  }
 0x17a PF: > { %s715_s19 = sand.u32 1, %s1159_s15   ;;  %p1582_p10 = scmp.ne.s32.totalorder %s1572_s22, 0 }
 0x17b   : > { %p1583_p13 = scmp.ge.s32.totalorder %s1171_s18, 2  ;;  %s716_s29 = scalar_lea.sflag [#allocation4], %s715_s19 }
 0x17d   : > { %p994_p3 = pnand %p1583_p13, %p1582_p10 }
 0x17f   : > { %1154 = dma.done.wait (!%p994_p3), %s716_s29, 4096  }
 0x180   : > { %1156 = vsyncadd (!%p994_p3), %s716_s29, 4294963200  ;;  %p18_p7 = scmp.ge.s32.totalorder %s1263_s27, 4   ;;  %s1584_s15 = smov %s1163_s16 }
 0x181   : > { %s1585_s16 = smov %s1167_s17  ;;  %s1586_s17 = smov %s1294_s24 }
 0x182   : > { %s1587_s18 = smov %s1263_s27  ;;  %20 = sbr.rel (!%p18_p7) target bundleno = 6 (0x6), region = 85 }
 0x189   :  { %721 = vsyncpa [#allocation3], 1 }
 0x18a   :  { %723 = vsyncpa [#allocation3 + $0x1], 1 }
 0x18b   :  { %724 = vsyncpa [#allocation6], 1 }
 0x18c   :  { %725 = vsyncpa [#allocation4], 1 }
 0x18d   :  { %727 = vsyncpa [#allocation4 + $0x1], 1 }

</bundles_post_ra>
